<compile_context>
chip_gen: v6e
topology: v6e:2x2x1
jax: 0.10.0
libtpu: 0.0.40
codegen_flags: <defaults>
</compile_context>

<pallas_src>
import math
import functools

import jax
import jax.numpy as jnp
from jax.experimental import pallas as pl
from jax.experimental.pallas import tpu as pltpu


def _attn_kernel(x_ref,        # (Bb, T, C)      input activations (f32)
                 kbias_ref,    # (Bb, 1, T)      key-padding bias: 0 or -inf (f32)
                 wqkv_ref,     # (C, 3C)         QKV weight, (in, out), compute dtype
                 bqkv_ref,     # (1, 3C)         QKV bias (f32)
                 wproj_ref,    # (C, C)          out-proj weight, (in, out), compute dtype
                 bproj_ref,    # (1, C)          out-proj bias (f32)
                 o_ref,        # (Bb, T, C)
                 *, n_head):
    Bb, T, C = x_ref.shape
    hd = C // n_head
    scale = 1.0 / math.sqrt(hd)
    cdt = wqkv_ref.dtype                      # MXU operand dtype (bf16 or f32)

    # ---- fused QKV projection over all Bb*T rows (batch folded into M) ----
    x2d = x_ref[...].reshape(Bb * T, C)
    qkv = jnp.dot(x2d.astype(cdt), wqkv_ref[...],
                  preferred_element_type=jnp.float32)
    qkv = qkv + bqkv_ref[...]                 # (Bb*T, 3C) f32

    q3 = (qkv[:, 0 * C:1 * C] * scale).reshape(Bb, T, C)
    k3 = qkv[:, 1 * C:2 * C].reshape(Bb, T, C)
    v3 = qkv[:, 2 * C:3 * C].reshape(Bb, T, C)

    # ---- one-time head-batched relayout: (Bb,T,C) -> (n_head*Bb, T, hd) ----
    # batch index g = h*Bb + b
    def to_heads(t3):
        return jnp.concatenate(
            [t3[:, :, h * hd:(h + 1) * hd] for h in range(n_head)], axis=0)

    qg, kg, vg = to_heads(q3), to_heads(k3), to_heads(v3)

    # ---- scores: single batched contraction on last dims (no explicit k.T) ----
    s = jnp.einsum('gqd,gkd->gqk', qg.astype(cdt), kg.astype(cdt),
                   preferred_element_type=jnp.float32)     # (G, T, T) f32

    # key-padding additive bias, shared across heads and query rows
    kbias = jnp.concatenate([kbias_ref[...]] * n_head, axis=0)   # (G, 1, T)
    s = s + kbias

    # ---- numerically stable softmax over keys (kept in f32) ----
    m = jnp.max(s, axis=-1, keepdims=True)
    p = jnp.exp(s - m)
    denom = jnp.sum(p, axis=-1, keepdims=True)
    att = p * pl.reciprocal(denom, approx=True)             # divide -> EUP slot

    # ---- attention-weighted values, batched over (head, batch) ----
    yg = jnp.einsum('gqk,gkd->gqd', att.astype(cdt), vg.astype(cdt),
                    preferred_element_type=jnp.float32)      # (G, T, hd) f32

    # ---- back to (Bb*T, C) head-major columns; no per-head masked stores ----
    y2d = jnp.concatenate(
        [yg[h * Bb:(h + 1) * Bb] for h in range(n_head)], axis=-1
    ).reshape(Bb * T, C)

    # ---- output projection + single full-width store ----
    out = jnp.dot(y2d.astype(cdt), wproj_ref[...],
                  preferred_element_type=jnp.float32) + bproj_ref[...]
    o_ref[...] = out.reshape(Bb, T, C).astype(o_ref.dtype)


def _pick_block_b(B, T, max_rows=512):
    """Largest divisor of B such that block_b*T stays a modest VMEM slab."""
    best = 1
    for cand in range(1, B + 1):
        if B % cand == 0 and cand * T <= max(max_rows, T):
            best = cand
    return best


def causal_self_attention(x, seq_ls, w_attn, b_attn, w_proj, b_proj, *,
                          n_head, compute_dtype=jnp.bfloat16, block_b=None):
    """x: (B, T, C) f32.  seq_ls: (B,) int.
    w_attn: (3C, C), b_attn: (3C,), w_proj: (C, C), b_proj: (C,) (PyTorch layout).
    compute_dtype: MXU operand dtype (f32 accumulation is always used)."""
    B, T, C = x.shape
    assert C % n_head == 0
    if block_b is None:
        block_b = _pick_block_b(B, T)
    assert B % block_b == 0

    # Pre-pack weights once in the wrapper (free XLA layout plumbing):
    # transpose to (in, out) and cast MXU operands; biases stay f32.
    wqkv = w_attn.T.astype(compute_dtype)                     # (C, 3C)
    bqkv = b_attn.reshape(1, 3 * C).astype(jnp.float32)
    wpr = w_proj.T.astype(compute_dtype)                      # (C, C)
    bpr = b_proj.reshape(1, C).astype(jnp.float32)

    # Key-padding mask as an additive 0/-inf bias, built once outside the kernel.
    key_valid = (jnp.arange(T, dtype=jnp.int32)[None, :]
                 < seq_ls.astype(jnp.int32)[:, None])         # (B, T)
    kbias = jnp.where(key_valid, 0.0, -jnp.inf).astype(jnp.float32)[:, None, :]

    kernel = functools.partial(_attn_kernel, n_head=n_head)
    grid = (B // block_b,)

    return pl.pallas_call(
        kernel,
        out_shape=jax.ShapeDtypeStruct((B, T, C), x.dtype),
        grid=grid,
        in_specs=[
            pl.BlockSpec((block_b, T, C), lambda i: (i, 0, 0)),   # x
            pl.BlockSpec((block_b, 1, T), lambda i: (i, 0, 0)),   # key bias
            pl.BlockSpec((C, 3 * C), lambda i: (0, 0)),           # Wqkv
            pl.BlockSpec((1, 3 * C), lambda i: (0, 0)),           # bqkv
            pl.BlockSpec((C, C), lambda i: (0, 0)),               # Wproj
            pl.BlockSpec((1, C), lambda i: (0, 0)),               # bproj
        ],
        out_specs=pl.BlockSpec((block_b, T, C), lambda i: (i, 0, 0)),
        compiler_params=pltpu.CompilerParams(
            dimension_semantics=("parallel",)),                   # v7x: 2 TCs
    )(x, kbias, wqkv, bqkv, wpr, bpr)


def _reference(x, seq_ls, w_attn, b_attn, w_proj, b_proj, n_head):
    """Pure-JAX port of the PyTorch forward (eval mode) for verification."""
    B, T, C = x.shape
    hd = C // n_head
    qkv = x @ w_attn.T + b_attn
    q, k, v = jnp.split(qkv, 3, axis=2)
    q = q.reshape(B, T, n_head, hd).transpose(0, 2, 1, 3)
    k = k.reshape(B, T, n_head, hd).transpose(0, 2, 1, 3)
    v = v.reshape(B, T, n_head, hd).transpose(0, 2, 1, 3)
    att = jnp.einsum("bhqd,bhkd->bhqk", q, k) / math.sqrt(hd)
    key_mask = (jnp.arange(T)[None, :] < seq_ls[:, None])        # (B, T_keys)
    att = jnp.where(key_mask[:, None, None, :], att, -jnp.inf)
    att = jax.nn.softmax(att, axis=-1)
    y = jnp.einsum("bhqk,bhkd->bhqd", att, v)
    y = y.transpose(0, 2, 1, 3).reshape(B, T, C)
    return y @ w_proj.T + b_proj


if __name__ == "__main__":
    # config: n_embed=32, n_head=4, dropout=0.0 ; B=2, T=8
    B, T, C, n_head = 2, 8, 32, 4

    key = jax.random.PRNGKey(0)
    kx, k1, k2, k3, k4 = jax.random.split(key, 5)

    x = jax.random.normal(kx, (B, T, C), dtype=jnp.float32)
    seq_ls = jnp.array([8, 5], dtype=jnp.int32)

    # Deterministic Linear-style init (uniform +-1/sqrt(fan_in)), PyTorch layout.
    bound = 1.0 / math.sqrt(C)
    w_attn = jax.random.uniform(k1, (3 * C, C), jnp.float32, -bound, bound)
    b_attn = jax.random.uniform(k2, (3 * C,), jnp.float32, -bound, bound)
    w_proj = jax.random.uniform(k3, (C, C), jnp.float32, -bound, bound)
    b_proj = jax.random.uniform(k4, (C,), jnp.float32, -bound, bound)

    y_ref = _reference(x, seq_ls, w_attn, b_attn, w_proj, b_proj, n_head)

    # Strict correctness check with f32 MXU operands.
    y_f32 = causal_self_attention(x, seq_ls, w_attn, b_attn, w_proj, b_proj,
                                  n_head=n_head, compute_dtype=jnp.float32)
    y_f32 = jax.block_until_ready(y_f32)
    assert y_f32.shape == (B, T, C)
    assert jnp.allclose(y_f32, y_ref, atol=2e-3, rtol=2e-3), "f32 mismatch vs reference"

    # Fast path: bf16 MXU operands with f32 accumulation (v6e/v7x MXU path).
    y_bf16 = causal_self_attention(x, seq_ls, w_attn, b_attn, w_proj, b_proj,
                                   n_head=n_head, compute_dtype=jnp.bfloat16)
    y_bf16 = jax.block_until_ready(y_bf16)
    assert y_bf16.shape == (B, T, C)
    assert jnp.allclose(y_bf16, y_ref, atol=5e-2, rtol=5e-2), "bf16 mismatch vs reference"

    print("KERNEL_OK")
</pallas_src>

<mosaic_0001>
module attributes {stable_mosaic.version = 11 : i64} {
  func.func @_attn_kernel(%arg0: i32, %arg1: memref<2x8x32xf32, #tpu.memory_space<vmem>>, %arg2: memref<2x1x8xf32, #tpu.memory_space<vmem>>, %arg3: memref<32x96xf32, #tpu.memory_space<vmem>>, %arg4: memref<1x96xf32, #tpu.memory_space<vmem>>, %arg5: memref<32x32xf32, #tpu.memory_space<vmem>>, %arg6: memref<1x32xf32, #tpu.memory_space<vmem>>, %arg7: memref<2x8x32xf32, #tpu.memory_space<vmem>>) attributes {dimension_semantics = [#tpu.dimension_semantics<parallel>], iteration_bounds = array<i64: 1>, scalar_prefetch = 0 : i64, scratch_operands = 0 : i64, tpu.core_type = #tpu.core_type<tc>, window_params = [{transform_indices = @transform_0, window_bounds = array<i64: 2, 8, 32>}, {transform_indices = @transform_1, window_bounds = array<i64: 2, 1, 8>}, {pipeline_mode = #tpu.pipeline_mode<synchronous>, transform_indices = @transform_2, window_bounds = array<i64: 32, 96>}, {pipeline_mode = #tpu.pipeline_mode<synchronous>, transform_indices = @transform_3, window_bounds = array<i64: 1, 96>}, {pipeline_mode = #tpu.pipeline_mode<synchronous>, transform_indices = @transform_4, window_bounds = array<i64: 32, 32>}, {pipeline_mode = #tpu.pipeline_mode<synchronous>, transform_indices = @transform_5, window_bounds = array<i64: 1, 32>}, {transform_indices = @transform_6, window_bounds = array<i64: 2, 8, 32>}]} {
    %c0 = arith.constant 0 : index
    %c0_0 = arith.constant 0 : index
    %c0_1 = arith.constant 0 : index
    %0 = vector.load %arg1[%c0, %c0_0, %c0_1] : memref<2x8x32xf32, #tpu.memory_space<vmem>>, vector<2x8x32xf32>
    %1 = vector.shape_cast %0 : vector<2x8x32xf32> to vector<16x32xf32>
    %c0_2 = arith.constant 0 : index
    %c0_3 = arith.constant 0 : index
    %2 = vector.load %arg3[%c0_2, %c0_3] : memref<32x96xf32, #tpu.memory_space<vmem>>, vector<32x96xf32>
    %cst = arith.constant dense<0.000000e+00> : vector<16x96xf32>
    %3 = tpu.matmul %1, %2, %cst {dimension_numbers = #tpu.dot_dimension_numbers<[1], [0], [0], [1], [0, 0, 1, 1], [], []>} : vector<16x32xf32>, vector<32x96xf32>, vector<16x96xf32> -> vector<16x96xf32>
    %c0_4 = arith.constant 0 : index
    %c0_5 = arith.constant 0 : index
    %4 = vector.load %arg4[%c0_4, %c0_5] : memref<1x96xf32, #tpu.memory_space<vmem>>, vector<1x96xf32>
    %5 = vector.broadcast %4 : vector<1x96xf32> to vector<16x96xf32>
    %6 = arith.addf %3, %5 : vector<16x96xf32>
    %7 = vector.extract_strided_slice %6 {offsets = [0, 0], sizes = [16, 32], strides = [1, 1]} : vector<16x96xf32> to vector<16x32xf32>
    %cst_6 = arith.constant 0.353553385 : f32
    %8 = vector.broadcast %cst_6 : f32 to vector<16x32xf32>
    %9 = arith.mulf %7, %8 : vector<16x32xf32>
    %10 = vector.shape_cast %9 : vector<16x32xf32> to vector<2x8x32xf32>
    %11 = vector.extract_strided_slice %6 {offsets = [0, 32], sizes = [16, 32], strides = [1, 1]} : vector<16x96xf32> to vector<16x32xf32>
    %12 = vector.shape_cast %11 : vector<16x32xf32> to vector<2x8x32xf32>
    %13 = vector.extract_strided_slice %6 {offsets = [0, 64], sizes = [16, 32], strides = [1, 1]} : vector<16x96xf32> to vector<16x32xf32>
    %14 = vector.shape_cast %13 : vector<16x32xf32> to vector<2x8x32xf32>
    %15 = vector.extract_strided_slice %10 {offsets = [0, 0, 0], sizes = [2, 8, 8], strides = [1, 1, 1]} : vector<2x8x32xf32> to vector<2x8x8xf32>
    %16 = vector.extract_strided_slice %10 {offsets = [0, 0, 8], sizes = [2, 8, 8], strides = [1, 1, 1]} : vector<2x8x32xf32> to vector<2x8x8xf32>
    %17 = vector.extract_strided_slice %10 {offsets = [0, 0, 16], sizes = [2, 8, 8], strides = [1, 1, 1]} : vector<2x8x32xf32> to vector<2x8x8xf32>
    %18 = vector.extract_strided_slice %10 {offsets = [0, 0, 24], sizes = [2, 8, 8], strides = [1, 1, 1]} : vector<2x8x32xf32> to vector<2x8x8xf32>
    %19 = tpu.concatenate %15, %16, %17, %18 in 0 : vector<2x8x8xf32>, vector<2x8x8xf32>, vector<2x8x8xf32>, vector<2x8x8xf32> -> vector<8x8x8xf32>
    %20 = vector.extract_strided_slice %12 {offsets = [0, 0, 0], sizes = [2, 8, 8], strides = [1, 1, 1]} : vector<2x8x32xf32> to vector<2x8x8xf32>
    %21 = vector.extract_strided_slice %12 {offsets = [0, 0, 8], sizes = [2, 8, 8], strides = [1, 1, 1]} : vector<2x8x32xf32> to vector<2x8x8xf32>
    %22 = vector.extract_strided_slice %12 {offsets = [0, 0, 16], sizes = [2, 8, 8], strides = [1, 1, 1]} : vector<2x8x32xf32> to vector<2x8x8xf32>
    %23 = vector.extract_strided_slice %12 {offsets = [0, 0, 24], sizes = [2, 8, 8], strides = [1, 1, 1]} : vector<2x8x32xf32> to vector<2x8x8xf32>
    %24 = tpu.concatenate %20, %21, %22, %23 in 0 : vector<2x8x8xf32>, vector<2x8x8xf32>, vector<2x8x8xf32>, vector<2x8x8xf32> -> vector<8x8x8xf32>
    %25 = vector.extract_strided_slice %14 {offsets = [0, 0, 0], sizes = [2, 8, 8], strides = [1, 1, 1]} : vector<2x8x32xf32> to vector<2x8x8xf32>
    %26 = vector.extract_strided_slice %14 {offsets = [0, 0, 8], sizes = [2, 8, 8], strides = [1, 1, 1]} : vector<2x8x32xf32> to vector<2x8x8xf32>
    %27 = vector.extract_strided_slice %14 {offsets = [0, 0, 16], sizes = [2, 8, 8], strides = [1, 1, 1]} : vector<2x8x32xf32> to vector<2x8x8xf32>
    %28 = vector.extract_strided_slice %14 {offsets = [0, 0, 24], sizes = [2, 8, 8], strides = [1, 1, 1]} : vector<2x8x32xf32> to vector<2x8x8xf32>
    %29 = tpu.concatenate %25, %26, %27, %28 in 0 : vector<2x8x8xf32>, vector<2x8x8xf32>, vector<2x8x8xf32>, vector<2x8x8xf32> -> vector<8x8x8xf32>
    "tpu.trace_start"() <{level = 10 : i32, message = "gqd,gkd->gqk"}> : () -> ()
    %cst_7 = arith.constant dense<0.000000e+00> : vector<8x8x8xf32>
    %30 = tpu.matmul %19, %24, %cst_7 {dimension_numbers = #tpu.dot_dimension_numbers<[2], [2], [1], [1], [0, 0, 0, 1, 1, 1], [0], [0]>} : vector<8x8x8xf32>, vector<8x8x8xf32>, vector<8x8x8xf32> -> vector<8x8x8xf32>
    "tpu.trace_stop"() : () -> ()
    %c0_8 = arith.constant 0 : index
    %c0_9 = arith.constant 0 : index
    %c0_10 = arith.constant 0 : index
    %31 = vector.load %arg2[%c0_8, %c0_9, %c0_10] : memref<2x1x8xf32, #tpu.memory_space<vmem>>, vector<2x1x8xf32>
    %32 = tpu.concatenate %31, %31, %31, %31 in 0 : vector<2x1x8xf32>, vector<2x1x8xf32>, vector<2x1x8xf32>, vector<2x1x8xf32> -> vector<8x1x8xf32>
    %33 = vector.broadcast %32 : vector<8x1x8xf32> to vector<8x8x8xf32>
    %34 = arith.addf %30, %33 : vector<8x8x8xf32>
    %cst_11 = arith.constant dense<0xFF800000> : vector<8x8xf32>
    %35 = vector.multi_reduction <maximumf>, %34, %cst_11 [2] : vector<8x8x8xf32> to vector<8x8xf32>
    %36 = vector.shape_cast %35 : vector<8x8xf32> to vector<8x8x1xf32>
    %37 = vector.broadcast %36 : vector<8x8x1xf32> to vector<8x8x8xf32>
    %38 = arith.subf %34, %37 : vector<8x8x8xf32>
    %39 = math.exp %38 : vector<8x8x8xf32>
    %cst_12 = arith.constant dense<0.000000e+00> : vector<8x8xf32>
    %40 = vector.multi_reduction <add>, %39, %cst_12 [2] : vector<8x8x8xf32> to vector<8x8xf32>
    %41 = vector.shape_cast %40 : vector<8x8xf32> to vector<8x8x1xf32>
    %42 = tpu.reciprocal %41 {approx = true} : vector<8x8x1xf32> -> vector<8x8x1xf32>
    %43 = vector.broadcast %42 : vector<8x8x1xf32> to vector<8x8x8xf32>
    %44 = arith.mulf %39, %43 : vector<8x8x8xf32>
    "tpu.trace_start"() <{level = 10 : i32, message = "gqk,gkd->gqd"}> : () -> ()
    %cst_13 = arith.constant dense<0.000000e+00> : vector<8x8x8xf32>
    %45 = tpu.matmul %44, %29, %cst_13 {dimension_numbers = #tpu.dot_dimension_numbers<[2], [1], [1], [2], [0, 0, 0, 1, 1, 2], [0], [0]>} : vector<8x8x8xf32>, vector<8x8x8xf32>, vector<8x8x8xf32> -> vector<8x8x8xf32>
    "tpu.trace_stop"() : () -> ()
    %46 = vector.extract_strided_slice %45 {offsets = [0, 0, 0], sizes = [2, 8, 8], strides = [1, 1, 1]} : vector<8x8x8xf32> to vector<2x8x8xf32>
    %47 = vector.extract_strided_slice %45 {offsets = [2, 0, 0], sizes = [2, 8, 8], strides = [1, 1, 1]} : vector<8x8x8xf32> to vector<2x8x8xf32>
    %48 = vector.extract_strided_slice %45 {offsets = [4, 0, 0], sizes = [2, 8, 8], strides = [1, 1, 1]} : vector<8x8x8xf32> to vector<2x8x8xf32>
    %49 = vector.extract_strided_slice %45 {offsets = [6, 0, 0], sizes = [2, 8, 8], strides = [1, 1, 1]} : vector<8x8x8xf32> to vector<2x8x8xf32>
    %50 = tpu.concatenate %46, %47, %48, %49 in 2 : vector<2x8x8xf32>, vector<2x8x8xf32>, vector<2x8x8xf32>, vector<2x8x8xf32> -> vector<2x8x32xf32>
    %51 = vector.shape_cast %50 : vector<2x8x32xf32> to vector<16x32xf32>
    %c0_14 = arith.constant 0 : index
    %c0_15 = arith.constant 0 : index
    %52 = vector.load %arg5[%c0_14, %c0_15] : memref<32x32xf32, #tpu.memory_space<vmem>>, vector<32x32xf32>
    %cst_16 = arith.constant dense<0.000000e+00> : vector<16x32xf32>
    %53 = tpu.matmul %51, %52, %cst_16 {dimension_numbers = #tpu.dot_dimension_numbers<[1], [0], [0], [1], [0, 0, 1, 1], [], []>} : vector<16x32xf32>, vector<32x32xf32>, vector<16x32xf32> -> vector<16x32xf32>
    %c0_17 = arith.constant 0 : index
    %c0_18 = arith.constant 0 : index
    %54 = vector.load %arg6[%c0_17, %c0_18] : memref<1x32xf32, #tpu.memory_space<vmem>>, vector<1x32xf32>
    %55 = vector.broadcast %54 : vector<1x32xf32> to vector<16x32xf32>
    %56 = arith.addf %53, %55 : vector<16x32xf32>
    %57 = vector.shape_cast %56 : vector<16x32xf32> to vector<2x8x32xf32>
    %c0_19 = arith.constant 0 : index
    %c0_20 = arith.constant 0 : index
    %c0_21 = arith.constant 0 : index
    %58 = vector.load %arg7[%c0_19, %c0_20, %c0_21] : memref<2x8x32xf32, #tpu.memory_space<vmem>>, vector<2x8x32xf32>
    tpu.vector_store %arg7[%c0_19, %c0_20, %c0_21], %57 {strides = array<i32>} : memref<2x8x32xf32, #tpu.memory_space<vmem>>, vector<2x8x32xf32>,
    return
  }
  func.func @transform_0(%arg0: i32) -> (i32, i32, i32) {
    %c0_i32 = arith.constant 0 : i32
    %c0_i32_0 = arith.constant 0 : i32
    %c0_i32_1 = arith.constant 0 : i32
    return %arg0, %c0_i32, %c0_i32_0 : i32, i32, i32
  }
  func.func @transform_1(%arg0: i32) -> (i32, i32, i32) {
    %c0_i32 = arith.constant 0 : i32
    %c0_i32_0 = arith.constant 0 : i32
    %c0_i32_1 = arith.constant 0 : i32
    return %arg0, %c0_i32, %c0_i32_0 : i32, i32, i32
  }
  func.func @transform_2(%arg0: i32) -> (i32, i32) {
    %c0_i32 = arith.constant 0 : i32
    %c0_i32_0 = arith.constant 0 : i32
    %c0_i32_1 = arith.constant 0 : i32
    return %c0_i32, %c0_i32_0 : i32, i32
  }
  func.func @transform_3(%arg0: i32) -> (i32, i32) {
    %c0_i32 = arith.constant 0 : i32
    %c0_i32_0 = arith.constant 0 : i32
    %c0_i32_1 = arith.constant 0 : i32
    return %c0_i32, %c0_i32_0 : i32, i32
  }
  func.func @transform_4(%arg0: i32) -> (i32, i32) {
    %c0_i32 = arith.constant 0 : i32
    %c0_i32_0 = arith.constant 0 : i32
    %c0_i32_1 = arith.constant 0 : i32
    return %c0_i32, %c0_i32_0 : i32, i32
  }
  func.func @transform_5(%arg0: i32) -> (i32, i32) {
    %c0_i32 = arith.constant 0 : i32
    %c0_i32_0 = arith.constant 0 : i32
    %c0_i32_1 = arith.constant 0 : i32
    return %c0_i32, %c0_i32_0 : i32, i32
  }
  func.func @transform_6(%arg0: i32) -> (i32, i32, i32) {
    %c0_i32 = arith.constant 0 : i32
    %c0_i32_0 = arith.constant 0 : i32
    %c0_i32_1 = arith.constant 0 : i32
    return %arg0, %c0_i32, %c0_i32_0 : i32, i32, i32
  }
}

</mosaic_0001>

<bundles_post_ra>
// kernel: tpu_custom_call.1
= control target key start
LH: loop header
LB: loop body
LE: loop exit
PB: predicated region body
PF: predicated region fallthrough
CT: control target
= control target key end

     0   :  { %11 = vsyncpa [#allocation3], 0  ;;  %s2270_s0 = inlined_call_operand.hbm [shape: f32[2,8,32], index: 0, kind: input, shape index: {}]   ;;  %s2271_s1 = inlined_call_operand.hbm [shape: f32[2,1,8], index: 1, kind: input, shape index: {}]   ;;  %s2272_s2 = inlined_call_operand.hbm [shape: f32[32,96], index: 2, kind: input, shape index: {}]   ;;  %s2273_s3 = inlined_call_operand.vmem [shape: f32[1,96], index: 3, kind: input, shape index: {}]   ;;  %s2274_s4 = inlined_call_operand.hbm [shape: f32[32,32], index: 4, kind: input, shape index: {}]   ;;  %s2275_s5 = inlined_call_operand.vmem [shape: f32[1,32], index: 5, kind: input, shape index: {}]   ;;  %s2276_s6 = inlined_call_operand.hbm [shape: f32[2,8,32], index: 6, kind: output, shape index: {}]  }
   0x1   :  { %12 = vsyncpa [#allocation6], 0 }
   0x2   :  { %13 = vsyncpa [#allocation9], 0 }
   0x3   :  { %14 = vsyncpa [#allocation4], 0  ;;  %s2003_s21 = smov [#allocation5]  }
   0x4   :  { %s32_s22 = sshll.u32 %s2003_s21, 4  ;;  %s33_s22 = int_to_ptr.vmem [resolvable:$true] %s32_s22 }
   0x5   :  { %s1903_s23 = scalar_lea.vmem %s33_s22, 32  ;;  %p1908_p1 = scmp.lt.s32.totalorder %s33_s22, %s33_s22 }
   0x6   :  { %p1904_p0 = scmp.ne.s32.totalorder %s33_s22, %s1903_s23  ;;  %p1909_p2 = scmp.lt.s32.totalorder %s1903_s23, %s1903_s23 }
   0x8   :  { %p1910_p3 = por %p1909_p2, %p1908_p1 }
   0xa   :  { %p1911_p4 = pnand %p1910_p3, %p1904_p0 }
   0xc   :  { %1914 = shalt.err (!%p1911_p4)
}
   0xd   :  { %s2004_s24 = smov 16   ;;  %s2005_s25 = smov 1  }
   0xe   :  { %38 = dma.hbm_to_vmem [thread:$0]  %s2271_s1, 32, %s33_s22, [#allocation6], %s2004_s24, %s2004_s24, %s2005_s25  }
   0xf   :  { %s2006_s28 = smov [#allocation2]  }
  0x10   :  { %s20_s29 = sshll.u32 %s2006_s28, 4  ;;  %s21_s29 = int_to_ptr.vmem [resolvable:$true] %s20_s29 }
  0x11   :  { %s1923_s30 = scalar_lea.vmem %s21_s29, 256  ;;  %p1928_p6 = scmp.lt.s32.totalorder %s21_s29, %s21_s29 }
  0x12   :  { %p1924_p5 = scmp.ne.s32.totalorder %s21_s29, %s1923_s30  ;;  %p1929_p7 = scmp.lt.s32.totalorder %s1923_s30, %s1923_s30 }
  0x14   :  { %p1930_p8 = por %p1929_p7, %p1928_p6 }
  0x16   :  { %p1931_p9 = pnand %p1930_p8, %p1924_p5 }
  0x18   :  { %1934 = shalt.err (!%p1931_p9)
}
  0x19   :  { %s2007_s7 = smov 128   ;;  %s2008_s8 = smov 8  }
  0x1a   :  { %26 = dma.hbm_to_vmem [thread:$0]  %s2270_s0, 256, %s21_s29, [#allocation3], %s2007_s7, %s2007_s7, %s2008_s8  }
  0x1b   :  { %s2009_s1 = smov [#allocation7]   ;;  %s2010_s12 = smov [#allocation8]  }
  0x1c   :  { %s44_s11 = sshll.u32 %s2009_s1, 4  ;;  %s58_s13 = sshll.u32 %s2010_s12, 4  ;;  %s45_s11 = int_to_ptr.vmem [resolvable:$true] %s44_s11  ;;  %s59_s13 = int_to_ptr.vmem [resolvable:$true] %s58_s13 }
  0x1d   :  { %s1943_s14 = scalar_lea.vmem %s45_s11, 512  ;;  %p1948_p11 = scmp.lt.s32.totalorder %s45_s11, %s45_s11 }
  0x1e   :  { %p1944_p10 = scmp.ne.s32.totalorder %s45_s11, %s1943_s14  ;;  %p1949_p12 = scmp.lt.s32.totalorder %s1943_s14, %s1943_s14 }
  0x20   :  { %p1950_p13 = por %p1949_p12, %p1948_p11 }
  0x22   :  { %p1951_p0 = pnand %p1950_p13, %p1944_p10 }
  0x24   :  { %1954 = shalt.err (!%p1951_p0)
}
  0x25   :  { %50 = dma.hbm_to_vmem [thread:$0]  %s2272_s2, 512, %s45_s11, [#allocation6], %s2007_s7, %s2007_s7, %s2008_s8  }
  0x26   :  { %s1963_s0 = scalar_lea.vmem %s59_s13, 512  ;;  %p1968_p2 = scmp.lt.s32.totalorder %s59_s13, %s59_s13 }
  0x27   :  { %p1964_p1 = scmp.ne.s32.totalorder %s59_s13, %s1963_s0  ;;  %p1969_p3 = scmp.lt.s32.totalorder %s1963_s0, %s1963_s0 }
  0x29   :  { %p1970_p4 = por %p1969_p3, %p1968_p2 }
  0x2b   :  { %p1971_p5 = pnand %p1970_p4, %p1964_p1 }
  0x2d   :  { %1974 = shalt.err (!%p1971_p5)
}
  0x2e   :  { %64 = dma.hbm_to_vmem [thread:$0]  %s2274_s4, 512, %s59_s13, [#allocation9], %s2007_s7, %s2007_s7, %s2008_s8  }
  0x2f   :  { %1995 = dma.done.wait [#allocation3], 256  }
  0x30   :  { %1996 = vsyncadd [#allocation3], 4294967040 }
  0x31   :  { %1997 = dma.done.wait [#allocation6], 544  }
  0x32   :  { %1998 = vsyncadd [#allocation6], 4294966752 }
  0x33   :  { %1999 = dma.done.wait [#allocation9], 512  }
  0x34   :  { %2000 = vsyncadd [#allocation9], 4294966784  ;;  %vm92_vm0 = vcmask 261120   ;;  %v84_v0 = vld [vmem:[#allocation7 + $0x18] sm:$0xff]  ;;  %v83_v1 = vld [vmem:[#allocation7 + $0x10] sm:$0xff]  ;;  %v2011_v7 = vmov 0.0  }
  0x35   :  { %1744 = vmatprep.subr.mxu0 %v84_v0  ;;  %v79_v2 = vld [vmem:[#allocation2] sm:$0xff]  ;;  %v81_v4 = vld [vmem:[#allocation7] sm:$0xff]  ;;  %v80_v5 = vld [vmem:[#allocation2 + $0x8] sm:$0xff]  ;;  %1755 = vmatprep.subr.mxu1 %v2011_v7  ;;  %s2012_s19 = smov 112   ;;  %s2013_s20 = smov 120   ;;  %vm2014_vm1 = vmmov 0  }
  0x36   :  { %1745 = vmatpush3.msra.mxu0 %v84_v0  ;;  %v82_v3 = vld [vmem:[#allocation7 + $0x8] sm:$0xff]  ;;  %1752 = vmatprep.mubr.msk.f32.mxu0 %vm92_vm0, %v79_v2  ;;  %s2016_s21 = smov 96   ;;  %vm220_vm2 = vcmask 64512   ;;  %v1671_v34 = vld [vmem:[#allocation5] ss:$0 sm:$0xff]  ;;  %s2017_s22 = smov 64  }
  0x37   :  { %1746 = vmatprep.subr.mxu0 %v83_v1  ;;  %v1668_v8 = vld [vmem:[%s2273_s3] ss:$0 sm:$0xff]  ;;  %1757 = vmatprep.mubr.msk.f32.mxu1 %vm2014_vm1, %v2011_v7  ;;  %s2015_s3 = smov 104   ;;  %v1672_v38 = vld [vmem:[#allocation5 + $0x1] ss:$0 sm:$0xff]  ;;  %s2018_s23 = smov 24  }
  0x38   :  { %1747 = vmatpush3.msra.mxu0 %v83_v1  ;;  %vm1549_vm3 = vcmask 130048   ;;  %vm1552_vm4 = vcmask 195584   ;;  %s2019_s26 = smov [#allocation10]  }
  0x39   :  { %1748 = vmatprep.subr.mxu0 %v82_v3  ;;  %s1654_s27 = sshll.u32 %s2019_s26, 4  ;;  %s1655_s27 = int_to_ptr.vmem [resolvable:$true] %s1654_s27 }
  0x3a   :  { %1749 = vmatpush3.msra.mxu0 %v82_v3  ;;  %s1975_s28 = scalar_lea.vmem %s1655_s27, 256  ;;  %p1980_p7 = scmp.lt.s32.totalorder %s1655_s27, %s1655_s27 }
  0x3b   :  { %1750 = vmatprep.subr.mxu0 %v81_v4  ;;  %p1976_p6 = scmp.ne.s32.totalorder %s1655_s27, %s1975_s28  ;;  %p1981_p8 = scmp.lt.s32.totalorder %s1975_s28, %s1975_s28 }
  0x3c   :  { %1751 = vmatpush3.msra.mxu0 %v81_v4 }
  0x3d   :  { %1753 = vmatmul.mubr.msk.f32.vlgmr.msra.gmra.mxu0 %vm92_vm0, %v80_v5  ;;  %1775 = vmatprep.subr.mxu0 %v2011_v7  ;;  %p1982_p9 = por %p1981_p8, %p1980_p7 }
  0x3e   :  { %1777 = vmatprep.mubr.msk.f32.mxu0 %vm2014_vm1, %v2011_v7 }
  0x3f   :  { %p1983_p10 = pnand %p1982_p9, %p1976_p6 }
  0xfd   :  { %v1754_v6 = vpop.f32.mrf.mxu0 }
  0xfe   :  { %v2094_v11 = vadd.f32 %v1754_v6, %v1668_v8 }
  0xff   :  { %v165_v9 = vpop.f32.mrf.mxu0 }
 0x100   :  { %v2085_v10 = vadd.f32 %v1668_v8, %v165_v9  ;;  %v175_v12 = vmul.f32 0.35355338, %v2094_v11 }
 0x102   :  { %196 = vrot.lane.b32.xlu1 %v2085_v10, %s2012_s19  ;;  %192 = vrot.lane.b32.xlu0 %v2085_v10, %s2013_s20  ;;  %v174_v13 = vmul.f32 0.35355338, %v2085_v10 }
 0x106   :  { %198 = vrot.lane.b32.xlu1 %v2094_v11, %s2012_s19  ;;  %194 = vrot.lane.b32.xlu0 %v2094_v11, %s2013_s20 }
 0x10a   :  { %202 = vrot.lane.b32.xlu1 %v2094_v11, %s2015_s3  ;;  %200 = vrot.lane.b32.xlu0 %v2085_v10, %s2015_s3 }
 0x10e   :  { %295 = vrot.lane.b32.xlu1 %v2094_v11, %s2016_s21  ;;  %218 = vrot.lane.b32.xlu0 %v2085_v10, %s2016_s21 }
 0x112   :  { %180 = vrot.lane.b32.xlu1 %v175_v12, %s2013_s20 }
 0x116   :  { %178 = vrot.lane.b32.xlu1 %v174_v13, %s2013_s20 }
 0x174   :  { %v2109_v14 = vpop.permute.xlu1 %196  ;;  %v2111_v15 = vpop.permute.xlu0 %192 }
 0x178   :  { %v2113_v16 = vpop.permute.xlu1 %198  ;;  %v2115_v17 = vpop.permute.xlu0 %194 }
 0x179   :  { %447 = vrot.lane.b32.xlu0 %v2115_v17, %s2016_s21  ;;  %599 = vrot.lane.b32.xlu1 %v2113_v16, %s2016_s21 }
 0x17c   :  { %v2121_v18 = vpop.permute.xlu0 %200  ;;  %v2126_v19 = vpop.permute.xlu1 %202 }
 0x17d   :  { %371 = vrot.lane.b32.xlu0 %v2111_v15, %s2016_s21  ;;  %184 = vrot.lane.b32.xlu1 %v175_v12, %s2012_s19 }
 0x180   :  { %v219_v20 = vpop.permute.xlu0 %218  ;;  %v296_v21 = vpop.permute.xlu1 %295 }
 0x181   :  { %1756 = vmatpush3.xpose.msk.msra.mxu1 %vm220_vm2, %v219_v20  ;;  %182 = vrot.lane.b32.xlu0 %v174_v13, %s2012_s19 }
 0x182   :  { %751 = vrot.lane.b32.xlu1 %v2126_v19, %s2016_s21  ;;  %1760 = vmatprep.subr.mxu1 %v2011_v7 }
 0x184   :  { %1758 = vmatmul.mubr.msk.f32.vlgmr.msra.gmra.mxu1 %vm220_vm2, %v174_v13  ;;  %v181_v22 = vpop.permute.xlu1 %180 }
 0x185   :  { %523 = vrot.lane.b32.xlu0 %v2109_v14, %s2016_s21  ;;  %1761 = vmatpush3.xpose.msk.msra.mxu1 %vm220_vm2, %v296_v21 }
 0x186   :  { %188 = vrot.lane.b32.xlu1 %v175_v12, %s2015_s3  ;;  %1762 = vmatprep.mubr.msk.f32.mxu1 %vm2014_vm1, %v2011_v7 }
 0x187   :  { %1765 = vmatprep.subr.mxu1 %v2011_v7 }
 0x188   :  { %1763 = vmatmul.mubr.msk.f32.vlgmr.msra.gmra.mxu1 %vm220_vm2, %v175_v12  ;;  %v179_v23 = vpop.permute.xlu1 %178 }
 0x189   :  { %675 = vrot.lane.b32.xlu0 %v2121_v18, %s2016_s21  ;;  %1767 = vmatprep.mubr.msk.f32.mxu1 %vm2014_vm1, %v2011_v7 }
 0x18d   :  { %186 = vrot.lane.b32.xlu0 %v174_v13, %s2015_s3 }
 0x1eb   :  { %v448_v24 = vpop.permute.xlu0 %447  ;;  %v600_v25 = vpop.permute.xlu1 %599 }
 0x1ef   :  { %v372_v26 = vpop.permute.xlu0 %371  ;;  %v185_v27 = vpop.permute.xlu1 %184 }
 0x1f0   :  { %1766 = vmatpush3.xpose.msk.msra.mxu1 %vm220_vm2, %v372_v26 }
 0x1f1   :  { %1770 = vmatprep.subr.mxu1 %v2011_v7 }
 0x1f3   :  { %v183_v28 = vpop.permute.xlu0 %182  ;;  %1768 = vmatmul.mubr.msk.f32.vlgmr.msra.gmra.mxu1 %vm220_vm2, %v179_v23 }
 0x1f4   :  { %1771 = vmatpush3.xpose.msk.msra.mxu1 %vm220_vm2, %v448_v24  ;;  %1772 = vmatprep.mubr.msk.f32.mxu1 %vm2014_vm1, %v2011_v7  ;;  %v752_v30 = vpop.permute.xlu1 %751 }
 0x1f5   :  { %1780 = vmatprep.subr.mxu1 %v2011_v7 }
 0x1f7   :  { %v524_v29 = vpop.permute.xlu0 %523  ;;  %1773 = vmatmul.mubr.msk.f32.vlgmr.msra.gmra.mxu1 %vm220_vm2, %v181_v22 }
 0x1f8   :  { %1776 = vmatpush3.xpose.msk.msra.mxu0 %vm220_vm2, %v524_v29  ;;  %1781 = vmatpush3.xpose.msk.msra.mxu1 %vm220_vm2, %v600_v25  ;;  %v189_v32 = vpop.permute.xlu1 %188 }
 0x1f9   :  { %1782 = vmatprep.mubr.msk.f32.mxu1 %vm2014_vm1, %v2011_v7  ;;  %1785 = vmatprep.subr.mxu0 %v2011_v7 }
 0x1fa   :  { %1790 = vmatprep.subr.mxu1 %v2011_v7 }
 0x1fb   :  { %1778 = vmatmul.mubr.msk.f32.vlgmr.msra.gmra.mxu0 %vm220_vm2, %v183_v28  ;;  %v676_v31 = vpop.permute.xlu0 %675  ;;  %1783 = vmatmul.mubr.msk.f32.vlgmr.msra.gmra.mxu1 %vm220_vm2, %v185_v27 }
 0x1fc   :  { %1786 = vmatpush3.xpose.msk.msra.mxu0 %vm220_vm2, %v676_v31  ;;  %1791 = vmatpush3.xpose.msk.msra.mxu1 %vm220_vm2, %v752_v30 }
 0x1fd   :  { %1792 = vmatprep.mubr.msk.f32.mxu1 %vm2014_vm1, %v2011_v7  ;;  %1787 = vmatprep.mubr.msk.f32.mxu0 %vm2014_vm1, %v2011_v7 }
 0x1fe   :  { %1800 = vmatprep.subr.mxu1 %v2011_v7  ;;  %1795 = vmatprep.subr.mxu0 %v2011_v7 }
 0x1ff   :  { %v187_v33 = vpop.permute.xlu0 %186  ;;  %1793 = vmatmul.mubr.msk.f32.vlgmr.msra.gmra.mxu1 %vm220_vm2, %v189_v32 }
 0x200   :  { %1788 = vmatmul.mubr.msk.f32.vlgmr.msra.gmra.mxu0 %vm220_vm2, %v187_v33  ;;  %1802 = vmatprep.mubr.msk.f32.mxu1 %vm2014_vm1, %v2011_v7 }
 0x201   :  { %1797 = vmatprep.mubr.msk.f32.mxu0 %vm2014_vm1, %v2011_v7 }
 0x244   :  { %v291_v35 = vpop.f32.mrf.mxu1 }
 0x245   :  { %v292_v36 = vadd.f32 %v1671_v34, %v291_v35 }
 0x246   :  { %v1759_v37 = vpop.f32.mrf.mxu1 }
 0x247   :  { %v827_v39 = vsel %vm220_vm2, %v292_v36, -inf }
 0x248   :  { %828 = vmax.xlane.f32.xlu0 %v827_v39  ;;  %v367_v40 = vpop.f32.mrf.mxu1 }
 0x249   :  { %v368_v41 = vadd.f32 %v1672_v38, %v367_v40 }
 0x24a   :  { %v1764_v42 = vpop.f32.mrf.mxu1 }
 0x24b   :  { %v830_v43 = vsel %vm220_vm2, %v368_v41, -inf }
 0x24c   :  { %831 = vmax.xlane.f32.xlu1 %v830_v43 }
 0x2b3   :  { %v443_v44 = vpop.f32.mrf.mxu1 }
 0x2b4   :  { %v444_v45 = vadd.f32 %v1671_v34, %v443_v44 }
 0x2b5   :  { %v1769_v46 = vpop.f32.mrf.mxu1 }
 0x2b6   :  { %v833_v47 = vsel %vm220_vm2, %v444_v45, -inf }
 0x2b7   :  { %834 = vmax.xlane.f32.xlu0 %v833_v47  ;;  %v519_v48 = vpop.f32.mrf.mxu1 }
 0x2b8   :  { %v520_v49 = vadd.f32 %v1672_v38, %v519_v48 }
 0x2b9   :  { %v1774_v50 = vpop.f32.mrf.mxu1 }
 0x2ba   :  { %v836_v51 = vsel %vm220_vm2, %v520_v49, -inf }
 0x2bb   :  { %v595_v52 = vpop.f32.mrf.mxu0  ;;  %837 = vmax.xlane.f32.xlu0 %v836_v51  ;;  %v671_v53 = vpop.f32.mrf.mxu1 }
 0x2bc   :  { %v596_v54 = vadd.f32 %v1671_v34, %v595_v52  ;;  %v672_v55 = vadd.f32 %v1672_v38, %v671_v53 }
 0x2bd   :  { %v1779_v56 = vpop.f32.mrf.mxu0  ;;  %v1784_v57 = vpop.f32.mrf.mxu1 }
 0x2be   :  { %v839_v58 = vsel %vm220_vm2, %v596_v54, -inf  ;;  %v842_v59 = vsel %vm220_vm2, %v672_v55, -inf }
 0x2bf   :  { %840 = vmax.xlane.f32.xlu1 %v839_v58  ;;  %843 = vmax.xlane.f32.xlu0 %v842_v59  ;;  %v823_v60 = vpop.f32.mrf.mxu1 }
 0x2c0   :  { %v824_v61 = vadd.f32 %v1672_v38, %v823_v60  ;;  %v747_v62 = vpop.f32.mrf.mxu0 }
 0x2c1   :  { %v748_v63 = vadd.f32 %v1671_v34, %v747_v62  ;;  %v1794_v0 = vpop.f32.mrf.mxu1 }
 0x2c2   :  { %v1789_v1 = vpop.f32.mrf.mxu0  ;;  %v848_v2 = vsel %vm220_vm2, %v824_v61, -inf }
 0x2c3   :  { %849 = vmax.xlane.f32.xlu0 %v848_v2  ;;  %v845_v3 = vsel %vm220_vm2, %v748_v63, -inf }
 0x2c4   :  { %846 = vmax.xlane.f32.xlu1 %v845_v3 }
 0x2d1   :  { %v829_v8 = vpop.xlane.xlu0 %828 }
 0x2d2   :  { %v851_v9 = vsub.f32 %v292_v36, %v829_v8 }
 0x2d5   :  { %915 = vrot.lane.b32.xlu1 %v2085_v10, %s2017_s22  ;;  %v832_v4 = vpop.xlane.xlu1 %831  ;;  %v859_v10 = vmul.f32 1.442695, %v851_v9 }
 0x2d6   :  { %v852_v5 = vsub.f32 %v368_v41, %v832_v4 }
 0x2d8   :  { %v861_v6 = vmul.f32 1.442695, %v852_v5 }
 0x2d9   :  { %1067 = vrot.lane.b32.xlu1 %v2111_v15, %s2017_s22  ;;  %991 = vrot.lane.b32.xlu0 %v2094_v11, %s2017_s22 }
 0x2da   :  { %1863 = vpow2.f32 %v861_v6 }
 0x2db   :  { %1865 = vpow2.f32 %v859_v10 }
 0x2dd   :  { %1143 = vrot.lane.b32.xlu1 %v2115_v17, %s2017_s22  ;;  %1219 = vrot.lane.b32.xlu0 %v2109_v14, %s2017_s22 }
 0x2e1   :  { %1295 = vrot.lane.b32.xlu1 %v2113_v16, %s2017_s22 }
 0x2e7   :  { %v2197_v12 = vpop.eup %1863 }
 0x2e8   :  { %v878_v11 = vsel %vm220_vm2, %v2197_v12, 0.0  ;;  %v2201_v13 = vpop.eup %1865 }
 0x2e9   :  { %v875_v14 = vsel %vm220_vm2, %v2201_v13, 0.0 }
 0x2fc   :  { %879 = vadd.xlane.f32.xlu0 %v878_v11 }
 0x305   :  { %876 = vadd.xlane.f32.xlu1 %v875_v14 }
 0x340   :  { %v835_v15 = vpop.xlane.xlu0 %834 }
 0x341   :  { %v853_v16 = vsub.f32 %v444_v45, %v835_v15 }
 0x343   :  { %v863_v17 = vmul.f32 1.442695, %v853_v16 }
 0x344   :  { %v838_v20 = vpop.xlane.xlu0 %837 }
 0x345   :  { %1867 = vpow2.f32 %v863_v17  ;;  %v854_v21 = vsub.f32 %v520_v49, %v838_v20  ;;  %v1558_v20 = vld [vmem:[#allocation8 + $0x18] sm:$0xff] }
 0x347   :  { %v865_v22 = vmul.f32 1.442695, %v854_v21  ;;  %v1557_v21 = vld [vmem:[#allocation8 + $0x10] sm:$0xff] }
 0x348   :  { %v841_v23 = vpop.xlane.xlu1 %840  ;;  %v844_v24 = vpop.xlane.xlu0 %843 }
 0x349   :  { %1869 = vpow2.f32 %v865_v22  ;;  %v855_v25 = vsub.f32 %v596_v54, %v841_v23  ;;  %v856_v26 = vsub.f32 %v672_v55, %v844_v24  ;;  %v1556_v22 = vld [vmem:[#allocation8 + $0x8] sm:$0xff]  ;;  %v1555_v24 = vld [vmem:[#allocation8] sm:$0xff] }
 0x34b   :  { %v867_v27 = vmul.f32 1.442695, %v855_v25  ;;  %v869_v28 = vmul.f32 1.442695, %v856_v26 }
 0x34c   :  { %v850_v29 = vpop.xlane.xlu0 %849 }
 0x34d   :  { %1871 = vpow2.f32 %v867_v27  ;;  %v858_v30 = vsub.f32 %v824_v61, %v850_v29  ;;  %v847_v31 = vpop.xlane.xlu1 %846 }
 0x34e   :  { %1873 = vpow2.f32 %v869_v28  ;;  %v857_v32 = vsub.f32 %v748_v63, %v847_v31 }
 0x34f   :  { %v873_v33 = vmul.f32 1.442695, %v858_v30 }
 0x350   :  { %v871_v34 = vmul.f32 1.442695, %v857_v32  ;;  %v992_v35 = vpop.permute.xlu0 %991 }
 0x351   :  { %1875 = vpow2.f32 %v873_v33  ;;  %v916_v36 = vpop.permute.xlu1 %915  ;;  %1801 = vmatpush3.msra.mxu1 %v992_v35 }
 0x352   :  { %v1868_v37 = vpop.eup %1867  ;;  %1877 = vpow2.f32 %v871_v34  ;;  %1796 = vmatpush3.msra.mxu0 %v916_v36  ;;  %1810 = vmatprep.subr.mxu1 %v2011_v7 }
 0x353   :  { %v881_v38 = vsel %vm220_vm2, %v1868_v37, 0.0  ;;  %1805 = vmatprep.subr.mxu0 %v2011_v7 }
 0x354   :  { %882 = vadd.xlane.f32.xlu1 %v881_v38  ;;  %v1220_v50 = vpop.permute.xlu0 %1219 }
 0x355   :  { %v1068_v49 = vpop.permute.xlu1 %1067 }
 0x356   :  { %v1870_v39 = vpop.eup %1869 }
 0x357   :  { %v884_v40 = vsel %vm220_vm2, %v1870_v39, 0.0 }
 0x358   :  { %885 = vadd.xlane.f32.xlu0 %v884_v40 }
 0x359   :  { %v1144_v51 = vpop.permute.xlu1 %1143 }
 0x35a   :  { %v1872_v41 = vpop.eup %1871 }
 0x35b   :  { %v1874_v42 = vpop.eup %1873  ;;  %v887_v43 = vsel %vm220_vm2, %v1872_v41, 0.0 }
 0x35c   :  { %888 = vadd.xlane.f32.xlu1 %v887_v43  ;;  %v890_v44 = vsel %vm220_vm2, %v1874_v42, 0.0 }
 0x35d   :  { %891 = vadd.xlane.f32.xlu0 %v890_v44  ;;  %v1296_v53 = vpop.permute.xlu1 %1295 }
 0x35e   :  { %v2211_v45 = vpop.eup %1875 }
 0x35f   :  { %v2213_v46 = vpop.eup %1877  ;;  %v896_v47 = vsel %vm220_vm2, %v2211_v45, 0.0 }
 0x360   :  { %v893_v48 = vsel %vm220_vm2, %v2213_v46, 0.0 }
 0x361   :  { %897 = vadd.xlane.f32.xlu0 %v896_v47  ;;  %894 = vadd.xlane.f32.xlu1 %v893_v48  ;;  %v1697_v47 = vld [vmem:[%s2275_s5] ss:$0 sm:$0xff] }
 0x372   :  { %1447 = vrot.lane.b32.xlu1 %v2126_v19, %s2017_s22 }
 0x377   :  { %1371 = vrot.lane.b32.xlu0 %v2121_v18, %s2017_s22 }
 0x385   :  { %v880_v52 = vpop.xlane.xlu0 %879 }
 0x386   :  { %1879 = vrcp.f32 %v880_v52 }
 0x38e   :  { %v877_v54 = vpop.xlane.xlu1 %876 }
 0x38f   :  { %1881 = vrcp.f32 %v877_v54 }
 0x393   :  { %v1880_v55 = vpop.eup %1879 }
 0x394   :  { %v908_v56 = vmul.f32 %v1880_v55, %v2197_v12 }
 0x396   :  { %1803 = vmatmul.mubr.msk.f32.vlgmr.msra.gmra.mxu1 %vm220_vm2, %v908_v56 }
 0x397   :  { %1811 = vmatpush3.msra.mxu1 %v1144_v51  ;;  %1812 = vmatprep.mubr.msk.f32.mxu1 %vm2014_vm1, %v2011_v7 }
 0x398   :  { %1820 = vmatprep.subr.mxu1 %v2011_v7 }
 0x39c   :  { %v1882_v18 = vpop.eup %1881 }
 0x39d   :  { %v907_v19 = vmul.f32 %v1882_v18, %v2201_v13 }
 0x39f   :  { %1798 = vmatmul.mubr.msk.f32.vlgmr.msra.gmra.mxu0 %vm220_vm2, %v907_v19 }
 0x3a0   :  { %1806 = vmatpush3.msra.mxu0 %v1068_v49  ;;  %1807 = vmatprep.mubr.msk.f32.mxu0 %vm2014_vm1, %v2011_v7 }
 0x3a1   :  { %1815 = vmatprep.subr.mxu0 %v2011_v7 }
 0x3dd   :  { %v883_v57 = vpop.xlane.xlu1 %882 }
 0x3de   :  { %1883 = vrcp.f32 %v883_v57 }
 0x3e1   :  { %v886_v58 = vpop.xlane.xlu0 %885 }
 0x3e2   :  { %1885 = vrcp.f32 %v886_v58 }
 0x3e5   :  { %v889_v59 = vpop.xlane.xlu1 %888 }
 0x3e6   :  { %1887 = vrcp.f32 %v889_v59  ;;  %v892_v60 = vpop.xlane.xlu0 %891 }
 0x3e7   :  { %1889 = vrcp.f32 %v892_v60 }
 0x3ea   :  { %v898_v61 = vpop.xlane.xlu0 %897  ;;  %v895_v62 = vpop.xlane.xlu1 %894 }
 0x3eb   :  { %v1884_v63 = vpop.eup %1883  ;;  %1891 = vrcp.f32 %v898_v61 }
 0x3ec   :  { %1893 = vrcp.f32 %v895_v62  ;;  %v909_v0 = vmul.f32 %v1884_v63, %v1868_v37 }
 0x3ee   :  { %1808 = vmatmul.mubr.msk.f32.vlgmr.msra.gmra.mxu0 %vm220_vm2, %v909_v0  ;;  %v1372_v8 = vpop.permute.xlu0 %1371  ;;  %v1448_v9 = vpop.permute.xlu1 %1447 }
 0x3ef   :  { %v1886_v1 = vpop.eup %1885  ;;  %1816 = vmatpush3.msra.mxu0 %v1220_v50  ;;  %1817 = vmatprep.mubr.msk.f32.mxu0 %vm2014_vm1, %v2011_v7 }
 0x3f0   :  { %v910_v2 = vmul.f32 %v1886_v1, %v1870_v39  ;;  %1825 = vmatprep.subr.mxu0 %v2011_v7 }
 0x3f2   :  { %1813 = vmatmul.mubr.msk.f32.vlgmr.msra.gmra.mxu1 %vm220_vm2, %v910_v2 }
 0x3f3   :  { %v1888_v3 = vpop.eup %1887  ;;  %1821 = vmatpush3.msra.mxu1 %v1296_v53  ;;  %1822 = vmatprep.mubr.msk.f32.mxu1 %vm2014_vm1, %v2011_v7 }
 0x3f4   :  { %v1890_v4 = vpop.eup %1889  ;;  %1830 = vmatprep.subr.mxu1 %v2011_v7  ;;  %v911_v5 = vmul.f32 %v1888_v3, %v1872_v41 }
 0x3f5   :  { %v912_v6 = vmul.f32 %v1890_v4, %v1874_v42 }
 0x3f6   :  { %1818 = vmatmul.mubr.msk.f32.vlgmr.msra.gmra.mxu0 %vm220_vm2, %v911_v5 }
 0x3f7   :  { %1823 = vmatmul.mubr.msk.f32.vlgmr.msra.gmra.mxu1 %vm220_vm2, %v912_v6  ;;  %1826 = vmatpush3.msra.mxu0 %v1372_v8 }
 0x3f8   :  { %v1892_v10 = vpop.eup %1891  ;;  %1831 = vmatpush3.msra.mxu1 %v1448_v9  ;;  %1832 = vmatprep.mubr.msk.f32.mxu1 %vm2014_vm1, %v2011_v7 }
 0x3f9   :  { %v1894_v12 = vpop.eup %1893  ;;  %1827 = vmatprep.mubr.msk.f32.mxu0 %vm2014_vm1, %v2011_v7  ;;  %v914_v11 = vmul.f32 %v1892_v10, %v2211_v45  ;;  %1835 = vmatprep.subr.mxu0 %v1558_v20 }
 0x3fa   :  { %v913_v13 = vmul.f32 %v1894_v12, %v2213_v46 }
 0x3fb   :  { %1833 = vmatmul.mubr.msk.f32.vlgmr.msra.gmra.mxu1 %vm220_vm2, %v914_v11 }
 0x3fc   :  { %1828 = vmatmul.mubr.msk.f32.vlgmr.msra.gmra.mxu0 %vm220_vm2, %v913_v13 }
 0x3fd   :  { %1836 = vmatpush3.msra.mxu0 %v1558_v20 }
 0x3fe   :  { %1837 = vmatprep.subr.mxu0 %v1557_v21 }
 0x3ff   :  { %1838 = vmatpush3.msra.mxu0 %v1557_v21 }
 0x400   :  { %1839 = vmatprep.subr.mxu0 %v1556_v22 }
 0x401   :  { %1840 = vmatpush3.msra.mxu0 %v1556_v22 }
 0x402   :  { %1841 = vmatprep.subr.mxu0 %v1555_v24 }
 0x403   :  { %1842 = vmatpush3.msra.mxu0 %v1555_v24 }
 0x456   :  { %v1063_v14 = vpop.f32.mrf.mxu1 }
 0x458   :  { %v1804_v15 = vpop.f32.mrf.mxu1 }
 0x45f   :  { %v987_v16 = vpop.f32.mrf.mxu0 }
 0x461   :  { %v1799_v17 = vpop.f32.mrf.mxu0 }
 0x4ae   :  { %v1139_v7 = vpop.f32.mrf.mxu0 }
 0x4af   :  { %1525 = vrot.lane.b32.xlu0 %v1139_v7, %s2008_s8 }
 0x4b0   :  { %v1809_v23 = vpop.f32.mrf.mxu0 }
 0x4b2   :  { %v1215_v25 = vpop.f32.mrf.mxu1 }
 0x4b3   :  { %1527 = vrot.lane.b32.xlu1 %v1215_v25, %s2008_s8 }
 0x4b4   :  { %v1814_v26 = vpop.f32.mrf.mxu1 }
 0x4b6   :  { %v1291_v27 = vpop.f32.mrf.mxu0 }
 0x4b7   :  { %v1367_v28 = vpop.f32.mrf.mxu1  ;;  %1533 = vrot.lane.b32.xlu0 %v1291_v27, %s2004_s24 }
 0x4b8   :  { %1535 = vrot.lane.b32.xlu1 %v1367_v28, %s2004_s24  ;;  %v1819_v29 = vpop.f32.mrf.mxu0 }
 0x4b9   :  { %v1824_v30 = vpop.f32.mrf.mxu1 }
 0x4bb   :  { %v1519_v31 = vpop.f32.mrf.mxu1 }
 0x4bc   :  { %v1443_v32 = vpop.f32.mrf.mxu0  ;;  %1543 = vrot.lane.b32.xlu1 %v1519_v31, %s2018_s23 }
 0x4bd   :  { %1541 = vrot.lane.b32.xlu0 %v1443_v32, %s2018_s23  ;;  %v1834_v33 = vpop.f32.mrf.mxu1 }
 0x4be   :  { %v1829_v34 = vpop.f32.mrf.mxu0 }
 0x521   :  { %v1526_v35 = vpop.permute.xlu0 %1525 }
 0x522   :  { %v1547_v39 = vsel %vm220_vm2, %v987_v16, %v1526_v35 }
 0x525   :  { %v1528_v36 = vpop.permute.xlu1 %1527 }
 0x526   :  { %v1548_v41 = vsel %vm220_vm2, %v1063_v14, %v1528_v36 }
 0x529   :  { %v1534_v37 = vpop.permute.xlu0 %1533 }
 0x52a   :  { %v1536_v38 = vpop.permute.xlu1 %1535  ;;  %v1550_v42 = vsel %vm1549_vm3, %v1547_v39, %v1534_v37 }
 0x52b   :  { %v1551_v44 = vsel %vm1549_vm3, %v1548_v41, %v1536_v38 }
 0x52e   :  { %v1544_v40 = vpop.permute.xlu1 %1543 }
 0x52f   :  { %v1542_v43 = vpop.permute.xlu0 %1541  ;;  %v1554_v46 = vsel %vm1552_vm4, %v1551_v44, %v1544_v40 }
 0x530   :  { %v1553_v45 = vsel %vm1552_vm4, %v1550_v42, %v1542_v43 }
 0x531   :  { %1843 = vmatprep.mubr.msk.f32.mxu0 %vm92_vm0, %v1553_v45 }
 0x532   :  { %1844 = vmatmul.mubr.msk.f32.vlgmr.msra.gmra.mxu0 %vm92_vm0, %v1554_v46 }
 0x5f2   :  { %v1845_v48 = vpop.f32.mrf.mxu0 }
 0x5f3   :  { %v1644_v49 = vadd.f32 %v1845_v48, %v1697_v47 }
 0x5f4   :  { %v1638_v50 = vpop.f32.mrf.mxu0 }
 0x5f5   :  { %1648 = vst.msk [vmem:[#allocation10 + $0x8] sm:$0xff] %vm92_vm0, %v1644_v49  ;;  %v1639_v51 = vadd.f32 %v1697_v47, %v1638_v50 }
 0x5f7   :  { %1647 = vst.msk [vmem:[#allocation10] sm:$0xff] %vm92_vm0, %v1639_v51 }
 0x5f8   :  { %1986 = shalt.err (!%p1983_p10)
}
 0x5f9   :  { %1660 = dma.vmem_to_hbm [thread:$0]  %s1655_s27, 256, %s2276_s6, [#allocation4], %s2007_s7, %s2007_s7, %s2008_s8  }
 0x5fa   :  { %2001 = dma.done.wait [#allocation4], 256  }
 0x5fb   :  { %2002 = vsyncadd [#allocation4], 4294967040 }
 0x5fc   :  { %1664 = vsyncpa [#allocation3], 1 }
 0x5fd   :  { %1665 = vsyncpa [#allocation6], 1 }
 0x5fe   :  { %1666 = vsyncpa [#allocation9], 1 }
 0x5ff   :  { %1667 = vsyncpa [#allocation4], 1 }

</bundles_post_ra>
